<compile_context>
chip_gen: v5e
topology: v5e:2x2
jax: 0.10.0
libtpu: 0.0.40
codegen_flags: <defaults>
</compile_context>

<pallas_src>
import math

import jax
import jax.numpy as jnp
from jax.experimental import pallas as pl
from jax.experimental.pallas import tpu as pltpu

INPUT_DIM = 11
OUTPUT_DIM = 12
NUM_HEADS = 4
HEAD_DIM = 24
D_IN = INPUT_DIM - 1            # 10
D_OUT = OUTPUT_DIM - 1          # 11
D_QKV = NUM_HEADS * HEAD_DIM    # 96


def _round_up(n, m):
    return ((n + m - 1) // m) * m


# ---------------------------------------------------------------------------
# Kernel: one fused matmul per batch block.
# ---------------------------------------------------------------------------
def mha_kernel(x_ref, w_ref, b_ref, o_ref):
    # x_ref: (block_b, 11), w_ref: (11, 12), b_ref: (1, 12) -> o_ref: (block_b, 12)
    o_ref[...] = (
        jnp.dot(x_ref[...], w_ref[...], preferred_element_type=jnp.float32)
        + b_ref[...]
    )


# ---------------------------------------------------------------------------
# Host-side parameter fusion (runs once, outside pallas_call).
# ---------------------------------------------------------------------------
def fuse_params(params):
    """Fold the whole forward into a single (11, 12) weight and (1, 12) bias.

    seq_len == 1  =>  softmax over the key axis == 1.0  =>  attention == V,
    so the Q/K projections never influence the output.
    """
    wq, bq, wk, bk, wv, bv, wo, bo = params
    del wq, bq, wk, bk                                  # provably dead
    w_fused = wv @ wo                                   # (10, 11)
    b_fused = bv @ wo + bo                              # (1, 11)

    w_full = jnp.zeros((INPUT_DIM, OUTPUT_DIM), jnp.float32)
    w_full = w_full.at[0, 0].set(1.0)                   # x_t pass-through
    w_full = w_full.at[1:, 1:].set(w_fused)
    b_full = jnp.zeros((1, OUTPUT_DIM), jnp.float32)
    b_full = b_full.at[:, 1:].set(b_fused)
    return w_full, b_full


# ---------------------------------------------------------------------------
# Wrapper.
# ---------------------------------------------------------------------------
def mha_forward(x, params, block_b=1024):
    B = x.shape[0]
    w_full, b_full = fuse_params(params)

    # Pick a large batch block (multiple of 8), clamped to the batch; keep at
    # least 2 grid steps when the batch is big enough so both TensorCores on
    # v7x get a share of the (parallel) grid axis.
    bb = min(block_b, _round_up(B, 8))
    if B > 16 and pl.cdiv(B, bb) < 2:
        bb = _round_up(pl.cdiv(B, 2), 8)
    grid = (pl.cdiv(B, bb),)

    return pl.pallas_call(
        mha_kernel,
        out_shape=jax.ShapeDtypeStruct((B, OUTPUT_DIM), jnp.float32),
        grid=grid,
        in_specs=[
            pl.BlockSpec((bb, INPUT_DIM), lambda i: (i, 0)),
            pl.BlockSpec((INPUT_DIM, OUTPUT_DIM), lambda i: (0, 0)),
            pl.BlockSpec((1, OUTPUT_DIM), lambda i: (0, 0)),
        ],
        out_specs=pl.BlockSpec((bb, OUTPUT_DIM), lambda i: (i, 0)),
        compiler_params=pltpu.CompilerParams(
            dimension_semantics=("parallel",)),
    )(x, w_full, b_full)


# ---------------------------------------------------------------------------
# Parameter init + pure-JAX reference (full, un-fused semantics).
# ---------------------------------------------------------------------------
def init_params(key):
    """Deterministic init mimicking nn.Linear's U(-1/sqrt(fan_in), +1/sqrt(fan_in)).

    Weights are stored pre-transposed as (in_features, out_features).
    """
    keys = jax.random.split(key, 8)

    def linear(kw, kb, fan_in, fan_out):
        bound = 1.0 / math.sqrt(fan_in)
        w_t = jax.random.uniform(kw, (fan_in, fan_out), jnp.float32, -bound, bound)
        b = jax.random.uniform(kb, (1, fan_out), jnp.float32, -bound, bound)
        return w_t, b

    wq, bq = linear(keys[0], keys[1], D_IN, D_QKV)
    wk, bk = linear(keys[2], keys[3], D_IN, D_QKV)
    wv, bv = linear(keys[4], keys[5], D_IN, D_QKV)
    wo, bo = linear(keys[6], keys[7], D_QKV, D_OUT)
    return (wq, bq, wk, bk, wv, bv, wo, bo)


def mha_reference(x, params):
    """Pure-JAX reference mirroring the PyTorch forward literally
    (Q/K/V projections, scaled-dot-product, softmax, output projection)."""
    wq, bq, wk, bk, wv, bv, wo, bo = params
    B = x.shape[0]
    x_t = x[:, 0:1]
    xf = x[:, 1:]
    q = (xf @ wq + bq).reshape(B, 1, NUM_HEADS, HEAD_DIM).transpose(0, 2, 1, 3)
    k = (xf @ wk + bk).reshape(B, 1, NUM_HEADS, HEAD_DIM).transpose(0, 2, 1, 3)
    v = (xf @ wv + bv).reshape(B, 1, NUM_HEADS, HEAD_DIM).transpose(0, 2, 1, 3)
    scores = jnp.einsum('bhqd,bhkd->bhqk', q, k) / math.sqrt(HEAD_DIM)
    aw = jax.nn.softmax(scores, axis=-1)           # length-1 axis -> all ones
    attn = jnp.einsum('bhqk,bhkd->bhqd', aw, v)
    attn = attn.transpose(0, 2, 1, 3).reshape(B, NUM_HEADS * HEAD_DIM)
    out = attn @ wo + bo
    return jnp.concatenate([x_t, out], axis=-1)


if __name__ == "__main__":
    key = jax.random.PRNGKey(0)
    k_x, k_p = jax.random.split(key)
    B = 64
    x = jax.random.normal(k_x, (B, INPUT_DIM), dtype=jnp.float32)
    params = init_params(k_p)

    out = mha_forward(x, params)
    out = jax.block_until_ready(out)

    ref = mha_reference(x, params)
    assert out.shape == (B, OUTPUT_DIM)
    # Fusion reassociates (x@Wv)@Wo -> x@(Wv@Wo); allow a small f32 rounding slack.
    assert jnp.allclose(out, ref, atol=1e-4, rtol=1e-4), "mismatch vs reference"

    # TODO(synk): dropout_layer is p=0 (identity at inference); no kernel needed.
    print("KERNEL_OK")
</pallas_src>

<mosaic_0001>
module attributes {stable_mosaic.version = 11 : i64} {
  func.func @mha_kernel(%arg0: i32, %arg1: memref<32x11xf32, #tpu.memory_space<vmem>>, %arg2: memref<11x12xf32, #tpu.memory_space<vmem>>, %arg3: memref<1x12xf32, #tpu.memory_space<vmem>>, %arg4: memref<32x12xf32, #tpu.memory_space<vmem>>) attributes {dimension_semantics = [#tpu.dimension_semantics<parallel>], iteration_bounds = array<i64: 2>, scalar_prefetch = 0 : i64, scratch_operands = 0 : i64, tpu.core_type = #tpu.core_type<tc>, window_params = [{transform_indices = @transform_0, window_bounds = array<i64: 32, 11>}, {pipeline_mode = #tpu.pipeline_mode<synchronous>, transform_indices = @transform_1, window_bounds = array<i64: 11, 12>}, {pipeline_mode = #tpu.pipeline_mode<synchronous>, transform_indices = @transform_2, window_bounds = array<i64: 1, 12>}, {transform_indices = @transform_3, window_bounds = array<i64: 32, 12>}]} {
    %c0 = arith.constant 0 : index
    %c0_0 = arith.constant 0 : index
    %0 = vector.load %arg1[%c0, %c0_0] : memref<32x11xf32, #tpu.memory_space<vmem>>, vector<32x11xf32>
    %c0_1 = arith.constant 0 : index
    %c0_2 = arith.constant 0 : index
    %1 = vector.load %arg2[%c0_1, %c0_2] : memref<11x12xf32, #tpu.memory_space<vmem>>, vector<11x12xf32>
    %cst = arith.constant dense<0.000000e+00> : vector<32x12xf32>
    %2 = tpu.matmul %0, %1, %cst {dimension_numbers = #tpu.dot_dimension_numbers<[1], [0], [0], [1], [0, 0, 1, 1], [], []>} : vector<32x11xf32>, vector<11x12xf32>, vector<32x12xf32> -> vector<32x12xf32>
    %c0_3 = arith.constant 0 : index
    %c0_4 = arith.constant 0 : index
    %3 = vector.load %arg3[%c0_3, %c0_4] : memref<1x12xf32, #tpu.memory_space<vmem>>, vector<1x12xf32>
    %4 = vector.broadcast %3 : vector<1x12xf32> to vector<32x12xf32>
    %5 = arith.addf %2, %4 : vector<32x12xf32>
    %c0_5 = arith.constant 0 : index
    %c0_6 = arith.constant 0 : index
    %6 = vector.load %arg4[%c0_5, %c0_6] : memref<32x12xf32, #tpu.memory_space<vmem>>, vector<32x12xf32>
    tpu.vector_store %arg4[%c0_5, %c0_6], %5 {strides = array<i32>} : memref<32x12xf32, #tpu.memory_space<vmem>>, vector<32x12xf32>,
    return
  }
  func.func @transform_0(%arg0: i32) -> (i32, i32) {
    %c0_i32 = arith.constant 0 : i32
    %c0_i32_0 = arith.constant 0 : i32
    return %arg0, %c0_i32 : i32, i32
  }
  func.func @transform_1(%arg0: i32) -> (i32, i32) {
    %c0_i32 = arith.constant 0 : i32
    %c0_i32_0 = arith.constant 0 : i32
    %c0_i32_1 = arith.constant 0 : i32
    return %c0_i32, %c0_i32_0 : i32, i32
  }
  func.func @transform_2(%arg0: i32) -> (i32, i32) {
    %c0_i32 = arith.constant 0 : i32
    %c0_i32_0 = arith.constant 0 : i32
    %c0_i32_1 = arith.constant 0 : i32
    return %c0_i32, %c0_i32_0 : i32, i32
  }
  func.func @transform_3(%arg0: i32) -> (i32, i32) {
    %c0_i32 = arith.constant 0 : i32
    %c0_i32_0 = arith.constant 0 : i32
    return %arg0, %c0_i32 : i32, i32
  }
}

</mosaic_0001>

<bundles_post_ra>
// kernel: tpu_custom_call.1
= control target key start
LH: loop header
LB: loop body
LE: loop exit
PB: predicated region body
PF: predicated region fallthrough
CT: control target
= control target key end

     0   :  { %s350_s12 = smov 0   ;;  %s376_s0 = inlined_call_operand.vmem [shape: f32[64,11], index: 0, kind: input, shape index: {}]   ;;  %s377_s1 = inlined_call_operand.vmem [shape: f32[11,12], index: 1, kind: input, shape index: {}]   ;;  %s378_s2 = inlined_call_operand.vmem [shape: f32[1,12], index: 2, kind: input, shape index: {}]   ;;  %s379_s3 = inlined_call_operand.vmem [shape: f32[64,12], index: 3, kind: output, shape index: {}]  }
   0x1 LB: > { %s291_s13 = sadd.s32 4294967295, %s328_s12   ;;  %p295_p0 = scmp.ge.s32.totalorder %s328_s12, 1  ;;  %s328_s12 = sphi %s350_s12, %s13_s12  }
   0x2   : > { %p138_p1 = scmp.lt.s32.totalorder %s328_s12, 3 }
   0x4   : > { %p139_p2 = pnand %p295_p0, %p138_p1 }
   0x5   : > { %s296_s18 = sshll.u32 (!%p139_p2), %s291_s13, 2 }
   0x6   : > { %142 = sbr.rel (%p139_p2) target bundleno = 152 (0x98), region = 32  ;;  %p163_p3 = scmp.lt.s32.totalorder (!%p139_p2), %s296_s18, 7 }
   0xb   : > { %v179_v0 = vld [vmem:[%s377_s1 + $0x8] sm:$0x7]  ;;  %vm197_vm0 = vcmask 1042432   ;;  %v178_v1 = vld [vmem:[%s377_s1] sm:$0xff]  ;;  %s381_s18 = smov (!%p163_p3, %s296_s18), 7  ;;  %vm184_vm1 = vcmask 89088  }
   0xc   : > { %308 = vmatpush.msk.msra.mxu2 %vm197_vm0, %v179_v0  ;;  %309 = vmatpush.msk.msra.mxu3 %vm197_vm0, %v179_v0  ;;  %s297_s19 = sshll.u32 %s381_s18, 3  ;;  %v321_v6 = vld [vmem:[%s378_s2] ss:$0 sm:$0xff]  ;;  %vm230_vm2 = vcmask 97280  }
   0xd   : > { %300 = vmatpush.msk.msra.mxu0 %vm197_vm0, %v179_v0  ;;  %307 = vmatpush.msk.msra.mxu1 %vm197_vm0, %v179_v0  ;;  %s166_s22 = scalar_lea.vmem %s376_s0, %s297_s19  ;;  %s172_s27 = scalar_lea.vmem %s379_s3, %s297_s19 }
   0xe   : > { %311 = vmatpush.msra.mxu2 %v178_v1  ;;  %312 = vmatpush.msra.mxu3 %v178_v1  ;;  %v176_v2 = vld [vmem:[%s166_s22 + $0x10] sm:$0xff]  ;;  %v177_v3 = vld [vmem:[%s166_s22 + $0x18] sm:$0xff]  ;;  %v174_v4 = vld [vmem:[%s166_s22] sm:$0xff] }
   0xf   : > { %216 = vmatpush.msra.mxu0 %v178_v1  ;;  %310 = vmatpush.msra.mxu1 %v178_v1  ;;  %v175_v5 = vld [vmem:[%s166_s22 + $0x8] sm:$0xff] }
  0x10   : > { %303 = vmatmul.msk.f32.vlgmr.msra.gmra.mxu2 %vm184_vm1, %v176_v2  ;;  %304 = vmatmul.msk.f32.vlgmr.msra.gmra.mxu3 %vm184_vm1, %v177_v3 }
  0x11   : > { %301 = vmatmul.msk.f32.vlgmr.msra.gmra.mxu0 %vm184_vm1, %v174_v4  ;;  %302 = vmatmul.msk.f32.vlgmr.msra.gmra.mxu1 %vm184_vm1, %v175_v5 }
  0x8e   : > { %v218_v7 = vpop.f32.mrf.mxu0  ;;  %v221_v8 = vpop.f32.mrf.mxu1 }
  0x8f   : > { %v219_v9 = vadd.f32 %v321_v6, %v218_v7  ;;  %v222_v10 = vadd.f32 %v321_v6, %v221_v8 }
  0x91   : > { %231 = vst.msk [vmem:[%s172_s27] sm:$0xff] %vm230_vm2, %v219_v9 }
  0x92   : > { %232 = vst.msk [vmem:[%s172_s27 + $0x8] sm:$0xff] %vm230_vm2, %v222_v10 }
  0x93   : > { %v224_v11 = vpop.f32.mrf.mxu2  ;;  %v227_v12 = vpop.f32.mrf.mxu3 }
  0x94   : > { %v225_v13 = vadd.f32 %v321_v6, %v224_v11  ;;  %v228_v14 = vadd.f32 %v321_v6, %v227_v12 }
  0x96   : > { %233 = vst.msk [vmem:[%s172_s27 + $0x10] sm:$0xff] %vm230_vm2, %v225_v13 }
  0x97   : > { %234 = vst.msk [vmem:[%s172_s27 + $0x18] sm:$0xff] %vm230_vm2, %v228_v14 }
  0x98 PF: > { %s13_s12 = sadd.s32 1, %s328_s12  }
  0x99   : > { %p10_p4 = scmp.ge.s32.totalorder %s13_s12, 4  }
  0x9b   :  { %12 = sbr.rel (!%p10_p4) target bundleno = 1 (0x1), region = 62 }

</bundles_post_ra>
